<compile_context>
chip_gen: v7x
topology: tpu7x:2x2x1
jax: 0.10.0
libtpu: 0.0.40
codegen_flags: <defaults>
</compile_context>

<pallas_src>
import functools

import jax
import jax.numpy as jnp
from jax.experimental import pallas as pl
from jax.experimental.pallas import tpu as pltpu


# ----------------------------------------------------------------------------
# Pallas kernels (feature-major: batch on the lane dimension)
# ----------------------------------------------------------------------------
def _neural_cf_kernel(h0, h1, x_ref, w1_ref, w2_ref, bias_ref, o_ref):
    """interact_tower (Linear+ReLU, Linear+ReLU) -> output Linear -> sigmoid.

    x_ref:    (2E, TB) bf16, rows [:E] movie emb, [E:] user emb.
    w1_ref:   (H0, 2E) bf16, w2_ref: (H1, H0) bf16 (PyTorch (out, in) layout).
    bias_ref: (H0 + 2*H1 + 1, 1) f32 packed as [b1; b2; wo; bo].
    o_ref:    (1, TB) f32, lane-dense.
    """
    b1 = bias_ref[0:h0]                              # (H0, 1)
    b2 = bias_ref[h0:h0 + h1]                        # (H1, 1)
    wo = bias_ref[h0 + h1:h0 + 2 * h1]               # (H1, 1)
    bo = bias_ref[h0 + 2 * h1:h0 + 2 * h1 + 1]       # (1, 1)

    h = jnp.dot(w1_ref[...], x_ref[...], preferred_element_type=jnp.float32)
    h = jnp.maximum(h + b1, 0.0)                     # (H0, TB) f32
    h = jnp.dot(w2_ref[...], h.astype(jnp.bfloat16),
                preferred_element_type=jnp.float32)
    h = jnp.maximum(h + b2, 0.0)                     # (H1, TB) f32
    # output Linear (H1 -> 1) as a VPU mul + sublane reduction (MXU N=1 avoided)
    logit = jnp.sum(h * wo, axis=0, keepdims=True) + bo
    o_ref[...] = jax.nn.sigmoid(logit)               # (1, TB)


def _two_tower_kernel(e, h0, h1, x_ref, w1_ref, w2_ref, bias_ref, o_ref):
    """Item & user towers (no zero padding), row-dot interaction, sigmoid.

    x_ref:    (2E, TB) bf16, rows [:E] movie emb, [E:] user emb.
    w1_ref:   (2*H0, E) bf16 = [iw1; uw1]; w2_ref: (2*H1, H0) bf16 = [iw2; uw2].
    bias_ref: (2*H0 + 2*H1, 1) f32 packed as [ib1; ub1; ib2; ub2].
    o_ref:    (1, TB) f32.
    """
    ib1 = bias_ref[0:h0]
    ub1 = bias_ref[h0:2 * h0]
    ib2 = bias_ref[2 * h0:2 * h0 + h1]
    ub2 = bias_ref[2 * h0 + h1:2 * h0 + 2 * h1]

    m = x_ref[0:e, :]                                # (E, TB) bf16
    u = x_ref[e:2 * e, :]

    hm = jnp.maximum(
        jnp.dot(w1_ref[0:h0], m, preferred_element_type=jnp.float32) + ib1, 0.0)
    hu = jnp.maximum(
        jnp.dot(w1_ref[h0:2 * h0], u, preferred_element_type=jnp.float32) + ub1, 0.0)
    hm = jnp.maximum(
        jnp.dot(w2_ref[0:h1], hm.astype(jnp.bfloat16),
                preferred_element_type=jnp.float32) + ib2, 0.0)
    hu = jnp.maximum(
        jnp.dot(w2_ref[h1:2 * h1], hu.astype(jnp.bfloat16),
                preferred_element_type=jnp.float32) + ub2, 0.0)

    dot = jnp.sum(hm * hu, axis=0, keepdims=True)    # (1, TB)
    o_ref[...] = jax.nn.sigmoid(dot)


# ----------------------------------------------------------------------------
# Wrapper helpers
# ----------------------------------------------------------------------------
def _pick_tile(b, block_b):
    """Pick a lane-dense batch tile.

    * capped at 8192 so v5e's 16 MiB scoped VMEM is never exceeded,
    * rounded to a multiple of 128 (lane width),
    * shrunk so the grid has >=2 steps when the batch allows it (v7x megacore).
    """
    block_b = max(128, min(int(block_b), 8192))
    half = (b + 1) // 2
    half_t = max(128, ((half + 127) // 128) * 128)
    tb = min(block_b, half_t)
    b_pad = ((b + tb - 1) // tb) * tb
    return tb, b_pad


def _embed_stack(params, movie_ids, user_ids, b_pad):
    """Pad ids (cheap int32), gather both tables, stack feature-major (2E, B_pad)."""
    b = movie_ids.shape[0]
    pad = b_pad - b
    mids = jnp.pad(movie_ids, (0, pad))
    uids = jnp.pad(user_ids, (0, pad))
    m = jnp.take(params["movie_emb_t"], mids, axis=1)     # (E, B_pad) bf16
    u = jnp.take(params["user_emb_t"], uids, axis=1)      # (E, B_pad) bf16
    return jnp.concatenate([m, u], axis=0)                # (2E, B_pad) bf16


def _weight_spec(shape):
    # whole-array VMEM block, constant index_map -> resident across the grid
    return pl.BlockSpec(shape, lambda i: (0, 0))


# ----------------------------------------------------------------------------
# Forward wrappers
# ----------------------------------------------------------------------------
@functools.partial(jax.jit, static_argnames=("block_b",))
def neural_cf_forward(movie_ids, user_ids, params, block_b=2048):
    """style == 'neural_cf'"""
    b = movie_ids.shape[0]
    tb, b_pad = _pick_tile(b, block_b)
    x = _embed_stack(params, movie_ids, user_ids, b_pad)   # (2E, B_pad) bf16
    two_e = x.shape[0]

    w1, w2, bias = params["w1"], params["w2"], params["ncf_bias"]
    h0, h1 = w1.shape[0], w2.shape[0]
    nt = b_pad // tb

    out = pl.pallas_call(
        functools.partial(_neural_cf_kernel, h0, h1),
        out_shape=jax.ShapeDtypeStruct((1, b_pad), jnp.float32),
        grid=(nt,),
        in_specs=[pl.BlockSpec((two_e, tb), lambda i: (0, i)),
                  _weight_spec(w1.shape),
                  _weight_spec(w2.shape),
                  _weight_spec(bias.shape)],
        out_specs=pl.BlockSpec((1, tb), lambda i: (0, i)),
        compiler_params=pltpu.CompilerParams(
            dimension_semantics=("parallel",)),
    )(x, w1, w2, bias)
    return out[0, :b].reshape(b, 1)


@functools.partial(jax.jit, static_argnames=("block_b",))
def two_tower_forward(movie_ids, user_ids, params, block_b=2048):
    """style == 'two_tower'"""
    b = movie_ids.shape[0]
    tb, b_pad = _pick_tile(b, block_b)
    x = _embed_stack(params, movie_ids, user_ids, b_pad)   # (2E, B_pad) bf16
    two_e = x.shape[0]
    e = two_e // 2

    w1, w2, bias = params["tt_w1"], params["tt_w2"], params["tt_bias"]
    h0, h1 = w1.shape[0] // 2, w2.shape[0] // 2
    nt = b_pad // tb

    out = pl.pallas_call(
        functools.partial(_two_tower_kernel, e, h0, h1),
        out_shape=jax.ShapeDtypeStruct((1, b_pad), jnp.float32),
        grid=(nt,),
        in_specs=[pl.BlockSpec((two_e, tb), lambda i: (0, i)),
                  _weight_spec(w1.shape),
                  _weight_spec(w2.shape),
                  _weight_spec(bias.shape)],
        out_specs=pl.BlockSpec((1, tb), lambda i: (0, i)),
        compiler_params=pltpu.CompilerParams(
            dimension_semantics=("parallel",)),
    )(x, w1, w2, bias)
    return out[0, :b].reshape(b, 1)


# ----------------------------------------------------------------------------
# Pure-JAX references (mirror the kernel's bf16-weight / bf16-MXU-input math)
# ----------------------------------------------------------------------------
def _ref_neural_cf(movie_ids, user_ids, p):
    m = jnp.take(p["movie_emb_t"], movie_ids, axis=1).astype(jnp.float32)
    u = jnp.take(p["user_emb_t"], user_ids, axis=1).astype(jnp.float32)
    x = jnp.concatenate([m, u], axis=0)                                # (2E, B)
    h = jax.nn.relu(p["w1"].astype(jnp.float32) @ x + p["b1"])
    h = h.astype(jnp.bfloat16).astype(jnp.float32)     # mirror kernel's bf16 cast
    h = jax.nn.relu(p["w2"].astype(jnp.float32) @ h + p["b2"])
    logit = jnp.sum(h * p["wo"], axis=0, keepdims=True) + p["bo"]
    return jax.nn.sigmoid(logit).reshape(-1, 1)


def _ref_two_tower(movie_ids, user_ids, p):
    m = jnp.take(p["movie_emb_t"], movie_ids, axis=1).astype(jnp.float32)
    u = jnp.take(p["user_emb_t"], user_ids, axis=1).astype(jnp.float32)

    def tower(x, w1, b1, w2, b2):
        h = jax.nn.relu(w1.astype(jnp.float32) @ x + b1)
        h = h.astype(jnp.bfloat16).astype(jnp.float32)
        return jax.nn.relu(w2.astype(jnp.float32) @ h + b2)

    mi = tower(m, p["iw1"], p["ib1"], p["iw2"], p["ib2"])
    us = tower(u, p["uw1"], p["ub1"], p["uw2"], p["ub2"])
    return jax.nn.sigmoid(jnp.sum(mi * us, axis=0, keepdims=True)).reshape(-1, 1)


# ----------------------------------------------------------------------------
# Deterministic parameter init (shapes implied by NeuralCFModel.__init__)
# ----------------------------------------------------------------------------
def make_params(key, fea_len, emb_dim, hidden_units):
    assert len(hidden_units) == 2, "script instantiates a 2-hidden-layer tower"
    h0, h1 = hidden_units
    ks = jax.random.split(key, 16)

    def w(k, shape, s=0.05):  # bf16 matmul weights (PyTorch (out, in) layout)
        return (s * jax.random.normal(k, shape, dtype=jnp.float32)).astype(jnp.bfloat16)

    def fb(k, shape, s=0.05):  # f32 biases / VPU-side weights
        return s * jax.random.normal(k, shape, dtype=jnp.float32)

    # neural_cf interact tower
    w1, b1 = w(ks[2], (h0, 2 * emb_dim)), fb(ks[3], (h0, 1))
    w2, b2 = w(ks[4], (h1, h0)), fb(ks[5], (h1, 1))
    wo, bo = fb(ks[6], (h1, 1)), fb(ks[7], (1, 1))

    # two_tower raw weights
    iw1, ib1 = w(ks[8], (h0, emb_dim)), fb(ks[9], (h0, 1))
    iw2, ib2 = w(ks[10], (h1, h0)), fb(ks[11], (h1, 1))
    uw1, ub1 = w(ks[12], (h0, emb_dim)), fb(ks[13], (h0, 1))
    uw2, ub2 = w(ks[14], (h1, h0)), fb(ks[15], (h1, 1))

    return {
        # embedding tables, stored transposed (emb_dim, vocab), bf16
        "movie_emb_t": w(ks[0], (emb_dim, fea_len["movieId"]), 0.1),
        "user_emb_t":  w(ks[1], (emb_dim, fea_len["userId"]), 0.1),
        # neural_cf
        "w1": w1, "b1": b1, "w2": w2, "b2": b2, "wo": wo, "bo": bo,
        "ncf_bias": jnp.concatenate([b1, b2, wo, bo], axis=0),        # (H0+2H1+1, 1)
        # two_tower raw (used by the pure-JAX reference)
        "iw1": iw1, "ib1": ib1, "iw2": iw2, "ib2": ib2,
        "uw1": uw1, "ub1": ub1, "uw2": uw2, "ub2": ub2,
        # two_tower stacked weights used by the kernel (no zero padding)
        "tt_w1":  jnp.concatenate([iw1, uw1], axis=0),                # (2*H0, E)
        "tt_w2":  jnp.concatenate([iw2, uw2], axis=0),                # (2*H1, H0)
        "tt_bias": jnp.concatenate([ib1, ub1, ib2, ub2], axis=0),     # (2*H0+2*H1, 1)
    }


if __name__ == "__main__":
    key = jax.random.PRNGKey(0)
    fea_len = {"movieId": 1001, "userId": 301}
    emb_dim = 16
    hidden_units = [32, 16]
    batch = 300  # not a multiple of 128 -> exercises id padding + 2-step grid

    pkey, mkey, ukey = jax.random.split(key, 3)
    params = make_params(pkey, fea_len, emb_dim, hidden_units)
    movie_ids = jax.random.randint(mkey, (batch,), 0, fea_len["movieId"], dtype=jnp.int32)
    user_ids = jax.random.randint(ukey, (batch,), 0, fea_len["userId"], dtype=jnp.int32)

    # style = 'neural_cf'
    out_ncf = jax.block_until_ready(neural_cf_forward(movie_ids, user_ids, params))
    ref_ncf = _ref_neural_cf(movie_ids, user_ids, params)
    assert out_ncf.shape == (batch, 1)
    assert jnp.allclose(out_ncf, ref_ncf, atol=1e-3, rtol=1e-3), \
        float(jnp.max(jnp.abs(out_ncf - ref_ncf)))

    # style = 'two_tower'
    out_tt = jax.block_until_ready(two_tower_forward(movie_ids, user_ids, params))
    ref_tt = _ref_two_tower(movie_ids, user_ids, params)
    assert out_tt.shape == (batch, 1)
    assert jnp.allclose(out_tt, ref_tt, atol=1e-3, rtol=1e-3), \
        float(jnp.max(jnp.abs(out_tt - ref_tt)))

    print("KERNEL_OK")
</pallas_src>

<mosaic_0001>
module attributes {stable_mosaic.version = 11 : i64} {
  func.func @_neural_cf_kernel(%arg0: i32, %arg1: memref<32x256xbf16, #tpu.memory_space<vmem>>, %arg2: memref<32x32xbf16, #tpu.memory_space<vmem>>, %arg3: memref<16x32xbf16, #tpu.memory_space<vmem>>, %arg4: memref<65x1xf32, #tpu.memory_space<vmem>>, %arg5: memref<1x256xf32, #tpu.memory_space<vmem>>) attributes {dimension_semantics = [#tpu.dimension_semantics<parallel>], iteration_bounds = array<i64: 2>, scalar_prefetch = 0 : i64, scratch_operands = 0 : i64, tpu.core_type = #tpu.core_type<tc>, window_params = [{transform_indices = @transform_0, window_bounds = array<i64: 32, 256>}, {pipeline_mode = #tpu.pipeline_mode<synchronous>, transform_indices = @transform_1, window_bounds = array<i64: 32, 32>}, {pipeline_mode = #tpu.pipeline_mode<synchronous>, transform_indices = @transform_2, window_bounds = array<i64: 16, 32>}, {pipeline_mode = #tpu.pipeline_mode<synchronous>, transform_indices = @transform_3, window_bounds = array<i64: 65, 1>}, {transform_indices = @transform_4, window_bounds = array<i64: 1, 256>}]} {
    %c0 = arith.constant 0 : index
    %c0_0 = arith.constant 0 : index
    %0 = vector.load %arg4[%c0, %c0_0] : memref<65x1xf32, #tpu.memory_space<vmem>>, vector<32x1xf32>
    %c32 = arith.constant 32 : index
    %c0_1 = arith.constant 0 : index
    %1 = vector.load %arg4[%c32, %c0_1] : memref<65x1xf32, #tpu.memory_space<vmem>>, vector<16x1xf32>
    %c48 = arith.constant 48 : index
    %c0_2 = arith.constant 0 : index
    %2 = vector.load %arg4[%c48, %c0_2] : memref<65x1xf32, #tpu.memory_space<vmem>>, vector<16x1xf32>
    %c64 = arith.constant 64 : index
    %c0_3 = arith.constant 0 : index
    %3 = vector.load %arg4[%c64, %c0_3] : memref<65x1xf32, #tpu.memory_space<vmem>>, vector<1x1xf32>
    %c0_4 = arith.constant 0 : index
    %c0_5 = arith.constant 0 : index
    %4 = vector.load %arg2[%c0_4, %c0_5] : memref<32x32xbf16, #tpu.memory_space<vmem>>, vector<32x32xbf16>
    %c0_6 = arith.constant 0 : index
    %c0_7 = arith.constant 0 : index
    %5 = vector.load %arg1[%c0_6, %c0_7] : memref<32x256xbf16, #tpu.memory_space<vmem>>, vector<32x256xbf16>
    %cst = arith.constant dense<0.000000e+00> : vector<32x256xf32>
    %6 = tpu.matmul %4, %5, %cst {dimension_numbers = #tpu.dot_dimension_numbers<[1], [0], [0], [1], [0, 0, 1, 1], [], []>} : vector<32x32xbf16>, vector<32x256xbf16>, vector<32x256xf32> -> vector<32x256xf32>
    %7 = vector.broadcast %0 : vector<32x1xf32> to vector<32x256xf32>
    %8 = arith.addf %6, %7 : vector<32x256xf32>
    %cst_8 = arith.constant 0.000000e+00 : f32
    %9 = vector.broadcast %cst_8 : f32 to vector<32x256xf32>
    %10 = arith.maximumf %8, %9 : vector<32x256xf32>
    %c0_9 = arith.constant 0 : index
    %c0_10 = arith.constant 0 : index
    %11 = vector.load %arg3[%c0_9, %c0_10] : memref<16x32xbf16, #tpu.memory_space<vmem>>, vector<16x32xbf16>
    %12 = arith.truncf %10 : vector<32x256xf32> to vector<32x256xbf16>
    %cst_11 = arith.constant dense<0.000000e+00> : vector<16x256xf32>
    %13 = tpu.matmul %11, %12, %cst_11 {dimension_numbers = #tpu.dot_dimension_numbers<[1], [0], [0], [1], [0, 0, 1, 1], [], []>} : vector<16x32xbf16>, vector<32x256xbf16>, vector<16x256xf32> -> vector<16x256xf32>
    %14 = vector.broadcast %1 : vector<16x1xf32> to vector<16x256xf32>
    %15 = arith.addf %13, %14 : vector<16x256xf32>
    %cst_12 = arith.constant 0.000000e+00 : f32
    %16 = vector.broadcast %cst_12 : f32 to vector<16x256xf32>
    %17 = arith.maximumf %15, %16 : vector<16x256xf32>
    %18 = vector.broadcast %2 : vector<16x1xf32> to vector<16x256xf32>
    %19 = arith.mulf %17, %18 : vector<16x256xf32>
    %cst_13 = arith.constant dense<0.000000e+00> : vector<256xf32>
    %20 = vector.multi_reduction <add>, %19, %cst_13 [0] : vector<16x256xf32> to vector<256xf32>
    %21 = vector.shape_cast %20 : vector<256xf32> to vector<1x256xf32>
    %22 = vector.broadcast %3 : vector<1x1xf32> to vector<1x256xf32>
    %23 = arith.addf %21, %22 : vector<1x256xf32>
    %24 = arith.negf %23 : vector<1x256xf32>
    %25 = math.exp %24 : vector<1x256xf32>
    %cst_14 = arith.constant 1.000000e+00 : f32
    %26 = vector.broadcast %cst_14 : f32 to vector<1x256xf32>
    %27 = arith.addf %26, %25 : vector<1x256xf32>
    %28 = arith.divf %26, %27 : vector<1x256xf32>
    %c0_15 = arith.constant 0 : index
    %c0_16 = arith.constant 0 : index
    %29 = vector.load %arg5[%c0_15, %c0_16] : memref<1x256xf32, #tpu.memory_space<vmem>>, vector<1x256xf32>
    tpu.vector_store %arg5[%c0_15, %c0_16], %28 {strides = array<i32>} : memref<1x256xf32, #tpu.memory_space<vmem>>, vector<1x256xf32>,
    return
  }
  func.func @transform_0(%arg0: i32) -> (i32, i32) {
    %c0_i32 = arith.constant 0 : i32
    %c0_i32_0 = arith.constant 0 : i32
    return %c0_i32, %arg0 : i32, i32
  }
  func.func @transform_1(%arg0: i32) -> (i32, i32) {
    %c0_i32 = arith.constant 0 : i32
    %c0_i32_0 = arith.constant 0 : i32
    %c0_i32_1 = arith.constant 0 : i32
    return %c0_i32, %c0_i32_0 : i32, i32
  }
  func.func @transform_2(%arg0: i32) -> (i32, i32) {
    %c0_i32 = arith.constant 0 : i32
    %c0_i32_0 = arith.constant 0 : i32
    %c0_i32_1 = arith.constant 0 : i32
    return %c0_i32, %c0_i32_0 : i32, i32
  }
  func.func @transform_3(%arg0: i32) -> (i32, i32) {
    %c0_i32 = arith.constant 0 : i32
    %c0_i32_0 = arith.constant 0 : i32
    %c0_i32_1 = arith.constant 0 : i32
    return %c0_i32, %c0_i32_0 : i32, i32
  }
  func.func @transform_4(%arg0: i32) -> (i32, i32) {
    %c0_i32 = arith.constant 0 : i32
    %c0_i32_0 = arith.constant 0 : i32
    return %c0_i32, %arg0 : i32, i32
  }
}

</mosaic_0001>

<bundles_post_ra>
// kernel: neural_cf_forward.1
= control target key start
LH: loop header
LB: loop body
LE: loop exit
PB: predicated region body
PF: predicated region fallthrough
CT: control target
= control target key end

     0   :  { %s699_s15 = smov 0   ;;  %s701_s16 = smov 0   ;;  %s790_s0 = inlined_call_operand.vmem [shape: bf16[32,512], index: 0, kind: input, shape index: {}]   ;;  %s791_s1 = inlined_call_operand.vmem [shape: bf16[32,32], index: 1, kind: input, shape index: {}]   ;;  %s792_s2 = inlined_call_operand.vmem [shape: bf16[16,32], index: 2, kind: input, shape index: {}]   ;;  %s793_s3 = inlined_call_operand.vmem [shape: f32[65,1], index: 3, kind: input, shape index: {}]   ;;  %s794_s4 = inlined_call_operand.vmem [shape: f32[1,512], index: 4, kind: output, shape index: {}]  }
   0x1   :  { %s703_s17 = smov 0  }
   0x2 LB: > { %s578_s18 = sadd.s32 4294967295, %s670_s17   ;;  %s716_s19 = sadd.s32 1, %s670_s17   ;;  %s670_s17 = sphi %s703_s17, %s797_s17   ;;  %s666_s16 = sphi %s701_s16, %s796_s16   ;;  %s662_s15 = sphi %s699_s15, %s795_s15  }
   0x3   : > { %s18_s20 = ssub.s32 %s670_s17, %s716_s19  ;;  %s21_s21 = sadd.s32 1, %s666_s16 }
   0x4   : > { %p19_p0 = scmp.eq.s32.totalorder %s18_s20, 0  ;;  %p28_p1 = scmp.ne.s32.totalorder %s666_s16, %s662_s15 }
   0x5   : > { %p29_p2 = scmp.eq.s32.totalorder %s670_s17, 0  ;;  %p581_p4 = scmp.ge.s32.totalorder %s670_s17, 2 }
   0x6   : > { %s725_s22 = scalar_select %p19_p0, %s666_s16, %s21_s21  }
   0x7   : > { %p30_p3 = por %p29_p2, %p28_p1  ;;  %152 = sbr.rel (%p581_p4) target bundleno = 21 (0x15), region = 28 }
   0xe   : > { %155 = sbr.rel (!%p30_p3) target bundleno = 21 (0x15), region = 32  ;;  %s157_s23 = sand.u32 (%p30_p3), 1, %s666_s16  }
   0xf   : > { %s602_s24 = sshll.u32 (%p30_p3), %s670_s17, 3  ;;  %s582_s25 = sshll.u32 (%p30_p3), %s157_s23, 5 }
  0x10   : > { %s162_s28 = scalar_lea.vmem (%p30_p3), %s790_s0, %s602_s24  ;;  %s159_s29 = scalar_lea.vmem (%p30_p3), [#allocation2], %s582_s25 }
  0x11   : > { %v196_v0 = vld [vmem:[%s162_s28] sm:$0xff] (%p30_p3)  ;;  %v198_v1 = vld [vmem:[%s162_s28 + $0x10] sm:$0xff] (%p30_p3) }
  0x12   : > { %v200_v2 = vld [vmem:[%s162_s28 + $0x20] sm:$0xff] (%p30_p3)  ;;  %197 = vst [vmem:[%s159_s29] sm:$0xff] (%p30_p3), %v196_v0  ;;  %199 = vst [vmem:[%s159_s29 + $0x8] sm:$0xff] (%p30_p3), %v198_v1  ;;  %v202_v3 = vld [vmem:[%s162_s28 + $0x30] sm:$0xff] (%p30_p3) }
  0x13   : > { %201 = vst [vmem:[%s159_s29 + $0x10] sm:$0xff] (%p30_p3), %v200_v2  ;;  %203 = vst [vmem:[%s159_s29 + $0x18] sm:$0xff] (%p30_p3), %v202_v3 }
  0x15 PF: > { %p585_p5 = scmp.ge.s32.totalorder %s670_s17, 1  ;;  %p208_p6 = scmp.lt.s32.totalorder %s670_s17, 3 }
  0x17   : > { %p209_p7 = pnand %p585_p5, %p208_p6 }
  0x18   : > { %s215_s30 = sand.u32 (!%p209_p7), 1, %s662_s15   ;;  %v672_v4 = vmov (!%p209_p7), 0   ;;  %v246_v5 = vld [vmem:[%s793_s3] sm:$0xff] (!%p209_p7)  ;;  %v247_v6 = vld [vmem:[%s793_s3 + $0x8] sm:$0xff] (!%p209_p7)  ;;  %v248_v10 = vld [vmem:[%s793_s3 + $0x10] sm:$0xff] (!%p209_p7)  ;;  %vm313_vm0 = vcmask (!%p209_p7), 261120  }
  0x19   : > { %212 = sbr.rel (%p209_p7) target bundleno = 539 (0x21b), region = 70  ;;  %s586_s5 = sshll.u32 (!%p209_p7), %s215_s30, 5  ;;  %352 = vmatprep.mubr.bf16.mxu0 (!%p209_p7), %v672_v4  ;;  %629 = vset.pattern.permute.xlu0 (!%p209_p7), %v672_v4  ;;  %v249_v12 = vld [vmem:[%s793_s3 + $0x18] sm:$0xff] (!%p209_p7)  ;;  %v250_v13 = vld [vmem:[%s793_s3 + $0x20] sm:$0xff] (!%p209_p7)  ;;  %v251_v15 = vld [vmem:[%s793_s3 + $0x28] sm:$0xff] (!%p209_p7) }
  0x1a   : > { %630 = vset.pattern.permute.xlu1 (!%p209_p7), %v672_v4  ;;  %437 = vmatprep.mubr.bf16.mxu1 (!%p209_p7), %v672_v4  ;;  %s217_s10 = scalar_lea.vmem (!%p209_p7), [#allocation2], %s586_s5  ;;  %v637_v14 = vld [vmem:[%s791_s1] sm:$0xff] (!%p209_p7)   ;;  %v252_v16 = vld [vmem:[%s793_s3 + $0x30] sm:$0xff] (!%p209_p7)  ;;  %v253_v17 = vld [vmem:[%s793_s3 + $0x38] sm:$0xff] (!%p209_p7) }
  0x1b   : > { %v631_v7 = vld [vmem:[%s217_s10 + $0x4] ss:$8 sps:$4 sm:$0xff] (!%p209_p7)   ;;  %265 = vperm.xlu0 (!%p209_p7), %629, %v246_v5   ;;  %v633_v8 = vld [vmem:[%s217_s10] ss:$8 sps:$4 sm:$0xff] (!%p209_p7)   ;;  %v634_v9 = vld [vmem:[%s217_s10 + $0x14] ss:$8 sps:$4 sm:$0xff] (!%p209_p7)   ;;  %275 = vperm.xlu1 (!%p209_p7), %630, %v248_v10  }
  0x1c   : > { %320 = vmatprep.subr.bf16.mxu0 (!%p209_p7), %v631_v7  ;;  %v636_v11 = vld [vmem:[%s217_s10 + $0x10] ss:$8 sps:$4 sm:$0xff] (!%p209_p7)   ;;  %v254_v18 = vld [vmem:[%s793_s3 + $0x40] sm:$0x1] (!%p209_p7)  ;;  %v638_v19 = vld [vmem:[%s791_s1 + $0x8] sm:$0xff] (!%p209_p7)   ;;  %s587_s10 = sshll.u32 (!%p209_p7), %s578_s18, 1 }
  0x1d   : > { %321 = vmatpush1.bf16.msra.mxu0 (!%p209_p7), %v633_v8  ;;  %v639_v52 = vld [vmem:[%s792_s2] sm:$0xff] (!%p209_p7)   ;;  %p241_p8 = scmp.lt.s32.totalorder (!%p209_p7), %s587_s10, 3 }
  0x1e   : > { %322 = vmatprep.subr.bf16.mxu0 (!%p209_p7), %v634_v9 }
  0x1f   : > { %270 = vperm.xlu0 (!%p209_p7), %629, %v247_v6   ;;  %280 = vperm.xlu1 (!%p209_p7), %630, %v249_v12  }
  0x20   : > { %s799_s10 = smov (!%p241_p8, %s587_s10), 3 }
  0x21   : > { %323 = vmatpush1.bf16.msra.mxu0 %v636_v11  ;;  %s243_s13 = scalar_lea.vmem %s794_s4, %s799_s10 }
  0x23   : > { %389 = vperm.xlu0 %629, %v250_v13   ;;  %394 = vperm.xlu1 %630, %v251_v15  }
  0x24   : > { %594 = vmatmul.mubr.msk.bf16.vlgmr.msra.gmra.mrb[0].mxu0 %vm313_vm0, %v637_v14 }
  0x25   : > { %362 = vmatprep.mubr.bf16.mxu0 %v672_v4 }
  0x27   : > { %454 = vperm.xlu0 %629, %v252_v16   ;;  %459 = vperm.xlu1 %630, %v253_v17  }
  0x2b   : > { %482 = vperm.xlu0 %629, %v254_v18  }
  0x2c   : > { %595 = vmatmul.mubr.msk.bf16.gmra.mrb[4].mxu0 %vm313_vm0, %v638_v19 }
  0x9a   : > { %v266_v20 = vpop.permute.xlu0 %265  ;;  %v276_v29 = vpop.permute.xlu1 %275 }
  0x9e   : > { %v271_v24 = vpop.permute.xlu0 %270  ;;  %v281_v40 = vpop.permute.xlu1 %280 }
  0xa2   : > { %v390_v53 = vpop.permute.xlu0 %389  ;;  %v395_v54 = vpop.permute.xlu1 %394 }
  0xa6   : > { %v455_v2 = vpop.permute.xlu0 %454  ;;  %v460_v3 = vpop.permute.xlu1 %459 }
  0xf7   : > { %v354_v21 = vpop.f32.mrb[0].mxu0 }
  0xf8   : > { %v355_v22 = vadd.f32 %v354_v21, %v266_v20  ;;  %v356_v23 = vpop.f32.mrb[1].mxu0 }
  0xf9   : > { %v357_v25 = vadd.f32 %v356_v23, %v266_v20  ;;  %v358_v26 = vpop.f32.mrb[2].mxu0 }
  0xfa   : > { %v359_v27 = vadd.f32 %v358_v26, %v271_v24  ;;  %v360_v28 = vpop.f32.mrb[3].mxu0  ;;  %v373_v31 = vmax.f32 %v355_v22, 0.0  ;;  %v483_v22 = vpop.permute.xlu0 %482 }
  0xfb   : > { %v361_v30 = vadd.f32 %v360_v28, %v271_v24  ;;  %v374_v33 = vmax.f32 %v357_v25, 0.0 }
  0xfc   : > { %v375_v32 = vmax.f32 %v359_v27, 0.0 }
  0xfd   : > { %v376_v34 = vmax.f32 %v361_v30, 0.0 }
  0xfe   : > { %v383_v35 = vpack.c.bf16 %v375_v32, %v373_v31  ;;  %v673_v32 = vmov 1966171168  }
  0xff   : > { %v364_v36 = vpop.f32.mrb[4].mxu0  ;;  %v384_v37 = vpack.c.bf16 %v376_v34, %v374_v33  ;;  %v503_v33 = vunpack.c.l.s4 %v673_v32  ;;  %v505_v34 = vlaneseq }
 0x100   : > { %v365_v38 = vadd.f32 %v364_v36, %v276_v29  ;;  %v366_v39 = vpop.f32.mrb[5].mxu0 }
 0x101   : > { %v367_v41 = vadd.f32 %v366_v39, %v276_v29  ;;  %v368_v42 = vpop.f32.mrb[6].mxu0  ;;  %405 = vmatprep.subr.bf16.mxu1 %v384_v37  ;;  %v506_v36 = vshrl.u32 %v505_v34, 7  ;;  %vm519_vm1 = vcmp.lt.s32.totalorder %v505_v34, 256 }
 0x102   : > { %v369_v43 = vadd.f32 %v368_v42, %v281_v40  ;;  %v370_v44 = vpop.f32.mrb[7].mxu0  ;;  %406 = vmatpush1.bf16.msra.mxu1 %v383_v35  ;;  %v377_v46 = vmax.f32 %v365_v38, 0.0  ;;  %v504_v35 = vunpack.c.0.s8 %v503_v33 }
 0x103   : > { %v371_v45 = vadd.f32 %v370_v44, %v281_v40  ;;  %v378_v48 = vmax.f32 %v367_v41, 0.0 }
 0x104   : > { %v379_v47 = vmax.f32 %v369_v43, 0.0  ;;  %v507_v38 = vsub.s32 %v504_v35, %v506_v36 }
 0x105   : > { %v380_v49 = vmax.f32 %v371_v45, 0.0 }
 0x106   : > { %v385_v50 = vpack.c.bf16 %v379_v47, %v377_v46 }
 0x107   : > { %v386_v51 = vpack.c.bf16 %v380_v49, %v378_v48 }
 0x109   : > { %407 = vmatprep.subr.bf16.mxu1 %v386_v51 }
 0x10a   : > { %408 = vmatpush1.bf16.msra.mxu1 %v385_v50 }
 0x10d   : > { %597 = vmatmul.mubr.msk.bf16.vlgmr.msra.gmra.mrb[0].mxu1 %vm313_vm0, %v639_v52 }
 0x1e0   : > { %v439_v55 = vpop.f32.mrb[0].mxu1 }
 0x1e1   : > { %v440_v56 = vadd.f32 %v439_v55, %v390_v53  ;;  %v441_v57 = vpop.f32.mrb[1].mxu1 }
 0x1e2   : > { %v442_v58 = vadd.f32 %v441_v57, %v390_v53  ;;  %v443_v59 = vpop.f32.mrb[2].mxu1 }
 0x1e3   : > { %v448_v60 = vmax.f32 %v440_v56, 0.0  ;;  %v444_v61 = vadd.f32 %v443_v59, %v395_v54  ;;  %v445_v62 = vpop.f32.mrb[3].mxu1 }
 0x1e4   : > { %v449_v63 = vmax.f32 %v442_v58, 0.0  ;;  %v446_v0 = vadd.f32 %v445_v62, %v395_v54 }
 0x1e5   : > { %v450_v1 = vmax.f32 %v444_v61, 0.0  ;;  %v462_v5 = vmul.f32 %v455_v2, %v448_v60 }
 0x1e6   : > { %v451_v4 = vmax.f32 %v446_v0, 0.0  ;;  %v463_v7 = vmul.f32 %v455_v2, %v449_v63 }
 0x1e7   : > { %v464_v6 = vmul.f32 %v460_v3, %v450_v1 }
 0x1e8   : > { %v465_v8 = vmul.f32 %v460_v3, %v451_v4 }
 0x1e9   : > { %v466_v9 = vadd.f32 %v464_v6, %v462_v5 }
 0x1ea   : > { %v473_v10 = vadd.f32 %v465_v8, %v463_v7 }
 0x1eb   : > { %v467_v11 = vrot.slane %v466_v9, 4 }
 0x1ec   : > { %v474_v12 = vrot.slane %v473_v10, 4 }
 0x1ed   : > { %v468_v13 = vadd.f32 %v467_v11, %v466_v9 }
 0x1ee   : > { %v475_v14 = vadd.f32 %v474_v12, %v473_v10 }
 0x1ef   : > { %v469_v15 = vrot.slane %v468_v13, 2 }
 0x1f0   : > { %v476_v16 = vrot.slane %v475_v14, 2 }
 0x1f1   : > { %v470_v17 = vadd.f32 %v469_v15, %v468_v13 }
 0x1f2   : > { %v477_v18 = vadd.f32 %v476_v16, %v475_v14 }
 0x1f3   : > { %v471_v19 = vrot.slane %v470_v17, 1 }
 0x1f4   : > { %v478_v20 = vrot.slane %v477_v18, 1 }
 0x1f5   : > { %v472_v21 = vadd.f32 %v471_v19, %v470_v17 }
 0x1f6   : > { %v479_v23 = vadd.f32 %v478_v20, %v477_v18 }
 0x1f7   : > { %v485_v24 = vadd.f32 %v483_v22, %v472_v21 }
 0x1f8   : > { %v486_v25 = vadd.f32 %v483_v22, %v479_v23 }
 0x1f9   : > { %v598_v26 = vmul.f32 -1.442695, %v485_v24 }
 0x1fa   : > { %v599_v27 = vmul.f32 -1.442695, %v486_v25 }
 0x1fb   : > { %640 = vpow2.f32 %v598_v26 }
 0x1fc   : > { %642 = vpow2.f32 %v599_v27 }
 0x205   : > { %v641_v28 = vpop.eup %640 }
 0x206   : > { %v643_v29 = vpop.eup %642  ;;  %v493_v30 = vadd.f32 1.0, %v641_v28 }
 0x207   : > { %v494_v31 = vadd.f32 1.0, %v643_v29 }
 0x208   : > { %644 = vrcp.f32 %v493_v30 }
 0x209   : > { %646 = vrcp.f32 %v494_v31 }
 0x212   : > { %v645_v37 = vpop.eup %644 }
 0x213   : > { %v647_v39 = vpop.eup %646 }
 0x214   : > { %v501_v40 = vcombine.low %v645_v37, %v647_v39 }
 0x216   : > { %v508_v41 = vrot.slane %v501_v40, %v507_v38 }
 0x218   : > { %v515_v42 = vrot.slane %v508_v41, %v507_v38 }
 0x21a   : > { %521 = vst.msk [vmem:[%s243_s13] sm:$0x3] %vm519_vm1, %v515_v42 }
 0x21b PF: > { %p11_p9 = scmp.ge.s32.totalorder %s716_s19, 4   ;;  %s795_s15 = smov %s666_s16 }
 0x21c   : > { %s796_s16 = smov %s725_s22  ;;  %s797_s17 = smov %s716_s19 }
 0x21d   :  { %13 = sbr.rel (!%p11_p9) target bundleno = 2 (0x2), region = 109 }

</bundles_post_ra>
